<compile_context>
chip_gen: v6e
topology: v6e:2x2x1
jax: 0.10.0
libtpu: 0.0.40
codegen_flags: <defaults>
</compile_context>

<pallas_src>
import math

import jax
import jax.numpy as jnp
from jax.experimental import pallas as pl
from jax.experimental.pallas import tpu as pltpu


def actor_kernel(x_ref, w1_ref, b1_ref, w2_ref, b2_ref, w3_ref, b3_ref, o_ref):
    # x and the weights arrive in bf16 (MXU-native); accumulate in f32,
    # do bias-add + tanh in f32, re-cast activations to bf16 for the next
    # MXU pass.
    h1 = jnp.tanh(
        jnp.dot(x_ref[...], w1_ref[...], preferred_element_type=jnp.float32)
        + b1_ref[...]
    )
    h2 = jnp.tanh(
        jnp.dot(h1.astype(jnp.bfloat16), w2_ref[...],
                preferred_element_type=jnp.float32)
        + b2_ref[...]
    )
    h3 = jnp.tanh(
        jnp.dot(h2.astype(jnp.bfloat16), w3_ref[...],
                preferred_element_type=jnp.float32)
        + b3_ref[...]
    )
    # TODO(synk): action_dim << 128 forces masked (vst.msk) output stores;
    # only switch to a transposed lane-dense output if profiling shows the
    # store slot binding (output bytes are tiny relative to the state stream).
    o_ref[...] = h3.astype(o_ref.dtype)


def actor_forward(state, params, *, block_batch=256):
    """Run the fused Actor MLP kernel.

    state:  (B, state_dim) float32
    params: dict with w1 (S,64), b1 (1,64), w2 (64,64), b2 (1,64),
            w3 (64,A),  b3 (1,A)   (all float32)
    returns: (B, A) float32
    """
    w1, b1 = params["w1"], params["b1"]
    w2, b2 = params["w2"], params["b2"]
    w3, b3 = params["w3"], params["b3"]

    B, S = state.shape
    H1 = w1.shape[1]
    H2 = w2.shape[1]
    A = w3.shape[1]

    # Batch tile: multiple of 8 (sublane), capped at block_batch; pad B up to
    # a multiple of the tile so every grid step gets a full block.
    tb = min(block_batch, max(8, ((B + 7) // 8) * 8))
    tb = ((tb + 7) // 8) * 8
    b_pad = ((B + tb - 1) // tb) * tb
    n_tiles = b_pad // tb

    # bf16 matmul inputs (halves state DMA bytes, single-pass MXU).
    x = state.astype(jnp.bfloat16)
    if b_pad != B:
        x = jnp.pad(x, ((0, b_pad - B), (0, 0)))
    w1b = w1.astype(jnp.bfloat16)
    w2b = w2.astype(jnp.bfloat16)
    w3b = w3.astype(jnp.bfloat16)

    flops = 2 * b_pad * (S * H1 + H1 * H2 + H2 * A)
    transcendentals = b_pad * (H1 + H2 + A)
    bytes_accessed = (
        x.size * x.dtype.itemsize
        + sum(int(a.size) * a.dtype.itemsize for a in (w1b, b1, w2b, b2, w3b, b3))
        + b_pad * A * 4
    )

    const2 = lambda i: (0, 0)  # weights/biases: VMEM-resident across the grid

    out = pl.pallas_call(
        actor_kernel,
        out_shape=jax.ShapeDtypeStruct((b_pad, A), jnp.float32),
        grid=(n_tiles,),
        in_specs=[
            pl.BlockSpec((tb, S), lambda i: (i, 0)),   # state: streamed per tile
            pl.BlockSpec((S, H1), const2),
            pl.BlockSpec((1, H1), const2),
            pl.BlockSpec((H1, H2), const2),
            pl.BlockSpec((1, H2), const2),
            pl.BlockSpec((H2, A), const2),
            pl.BlockSpec((1, A), const2),
        ],
        out_specs=pl.BlockSpec((tb, A), lambda i: (i, 0)),
        compiler_params=pltpu.CompilerParams(
            dimension_semantics=("parallel",),  # megacore sharding on v7x
        ),
        cost_estimate=pl.CostEstimate(
            flops=flops,
            transcendentals=transcendentals,
            bytes_accessed=bytes_accessed,
        ),
    )(x, w1b, b1, w2b, b2, w3b, b3)

    return out[:B]


def init_actor_params(key, state_dim, action_dim, hidden=64):
    """Deterministic init mimicking PyTorch nn.Linear default (U(+-1/sqrt(fan_in)))."""
    def linear_init(k, fan_in, fan_out):
        kw, kb = jax.random.split(k)
        bound = 1.0 / math.sqrt(fan_in)
        # stored as (in, out) so the kernel can do x @ W
        w = jax.random.uniform(kw, (fan_in, fan_out), jnp.float32, -bound, bound)
        b = jax.random.uniform(kb, (1, fan_out), jnp.float32, -bound, bound)
        return w, b

    k1, k2, k3 = jax.random.split(key, 3)
    w1, b1 = linear_init(k1, state_dim, hidden)
    w2, b2 = linear_init(k2, hidden, hidden)
    w3, b3 = linear_init(k3, hidden, action_dim)
    return {"w1": w1, "b1": b1, "w2": w2, "b2": b2, "w3": w3, "b3": b3}


def actor_reference_f32(state, params):
    """Pure-JAX f32 reference (matches the PyTorch module exactly)."""
    h = jnp.tanh(state @ params["w1"] + params["b1"])
    h = jnp.tanh(h @ params["w2"] + params["b2"])
    h = jnp.tanh(h @ params["w3"] + params["b3"])
    return h


def actor_reference_bf16(state, params):
    """Pure-JAX reference with the same bf16-input / f32-accumulate recipe."""
    def dot(a, w):
        return jnp.dot(a.astype(jnp.bfloat16), w.astype(jnp.bfloat16),
                       preferred_element_type=jnp.float32)
    h = jnp.tanh(dot(state, params["w1"]) + params["b1"])
    h = jnp.tanh(dot(h, params["w2"]) + params["b2"])
    h = jnp.tanh(dot(h, params["w3"]) + params["b3"])
    return h


if __name__ == "__main__":
    key = jax.random.PRNGKey(0)
    k_params, k_state, k_state2 = jax.random.split(key, 3)

    state_dim = 16
    action_dim = 4
    params = init_actor_params(k_params, state_dim, action_dim)

    # Small case (single grid step).
    batch = 8
    state = jax.random.normal(k_state, (batch, state_dim), jnp.float32)
    out = jax.block_until_ready(actor_forward(state, params))
    assert out.shape == (batch, action_dim)
    assert jnp.allclose(out, actor_reference_bf16(state, params),
                        atol=2e-3, rtol=1e-3), "mismatch vs bf16 reference"
    assert jnp.allclose(out, actor_reference_f32(state, params),
                        atol=2e-2, rtol=2e-2), "mismatch vs f32 reference"

    # Multi-tile case (exercises the batch grid + padding path).
    batch2 = 300  # not a multiple of the 256 tile -> padded to 512, 2 tiles
    state2 = jax.random.normal(k_state2, (batch2, state_dim), jnp.float32)
    out2 = jax.block_until_ready(actor_forward(state2, params))
    assert out2.shape == (batch2, action_dim)
    assert jnp.allclose(out2, actor_reference_bf16(state2, params),
                        atol=2e-3, rtol=1e-3), "mismatch vs bf16 reference (tiled)"
    assert jnp.allclose(out2, actor_reference_f32(state2, params),
                        atol=2e-2, rtol=2e-2), "mismatch vs f32 reference (tiled)"

    print("KERNEL_OK")
</pallas_src>

<mosaic_0001>
module attributes {stable_mosaic.version = 11 : i64} {
  func.func @actor_kernel(%arg0: i32, %arg1: memref<8x16xbf16, #tpu.memory_space<vmem>>, %arg2: memref<16x64xbf16, #tpu.memory_space<vmem>>, %arg3: memref<1x64xf32, #tpu.memory_space<vmem>>, %arg4: memref<64x64xbf16, #tpu.memory_space<vmem>>, %arg5: memref<1x64xf32, #tpu.memory_space<vmem>>, %arg6: memref<64x4xbf16, #tpu.memory_space<vmem>>, %arg7: memref<1x4xf32, #tpu.memory_space<vmem>>, %arg8: memref<8x4xf32, #tpu.memory_space<vmem>>) attributes {dimension_semantics = [#tpu.dimension_semantics<parallel>], iteration_bounds = array<i64: 1>, scalar_prefetch = 0 : i64, scratch_operands = 0 : i64, tpu.core_type = #tpu.core_type<tc>, window_params = [{transform_indices = @transform_0, window_bounds = array<i64: 8, 16>}, {pipeline_mode = #tpu.pipeline_mode<synchronous>, transform_indices = @transform_1, window_bounds = array<i64: 16, 64>}, {pipeline_mode = #tpu.pipeline_mode<synchronous>, transform_indices = @transform_2, window_bounds = array<i64: 1, 64>}, {pipeline_mode = #tpu.pipeline_mode<synchronous>, transform_indices = @transform_3, window_bounds = array<i64: 64, 64>}, {pipeline_mode = #tpu.pipeline_mode<synchronous>, transform_indices = @transform_4, window_bounds = array<i64: 1, 64>}, {pipeline_mode = #tpu.pipeline_mode<synchronous>, transform_indices = @transform_5, window_bounds = array<i64: 64, 4>}, {pipeline_mode = #tpu.pipeline_mode<synchronous>, transform_indices = @transform_6, window_bounds = array<i64: 1, 4>}, {transform_indices = @transform_7, window_bounds = array<i64: 8, 4>}]} {
    %c0 = arith.constant 0 : index
    %c0_0 = arith.constant 0 : index
    %0 = vector.load %arg1[%c0, %c0_0] : memref<8x16xbf16, #tpu.memory_space<vmem>>, vector<8x16xbf16>
    %c0_1 = arith.constant 0 : index
    %c0_2 = arith.constant 0 : index
    %1 = vector.load %arg2[%c0_1, %c0_2] : memref<16x64xbf16, #tpu.memory_space<vmem>>, vector<16x64xbf16>
    %cst = arith.constant dense<0.000000e+00> : vector<8x64xf32>
    %2 = tpu.matmul %0, %1, %cst {dimension_numbers = #tpu.dot_dimension_numbers<[1], [0], [0], [1], [0, 0, 1, 1], [], []>} : vector<8x16xbf16>, vector<16x64xbf16>, vector<8x64xf32> -> vector<8x64xf32>
    %c0_3 = arith.constant 0 : index
    %c0_4 = arith.constant 0 : index
    %3 = vector.load %arg3[%c0_3, %c0_4] : memref<1x64xf32, #tpu.memory_space<vmem>>, vector<1x64xf32>
    %4 = vector.broadcast %3 : vector<1x64xf32> to vector<8x64xf32>
    %5 = arith.addf %2, %4 : vector<8x64xf32>
    %6 = math.tanh %5 : vector<8x64xf32>
    %7 = arith.truncf %6 : vector<8x64xf32> to vector<8x64xbf16>
    %c0_5 = arith.constant 0 : index
    %c0_6 = arith.constant 0 : index
    %8 = vector.load %arg4[%c0_5, %c0_6] : memref<64x64xbf16, #tpu.memory_space<vmem>>, vector<64x64xbf16>
    %cst_7 = arith.constant dense<0.000000e+00> : vector<8x64xf32>
    %9 = tpu.matmul %7, %8, %cst_7 {dimension_numbers = #tpu.dot_dimension_numbers<[1], [0], [0], [1], [0, 0, 1, 1], [], []>} : vector<8x64xbf16>, vector<64x64xbf16>, vector<8x64xf32> -> vector<8x64xf32>
    %c0_8 = arith.constant 0 : index
    %c0_9 = arith.constant 0 : index
    %10 = vector.load %arg5[%c0_8, %c0_9] : memref<1x64xf32, #tpu.memory_space<vmem>>, vector<1x64xf32>
    %11 = vector.broadcast %10 : vector<1x64xf32> to vector<8x64xf32>
    %12 = arith.addf %9, %11 : vector<8x64xf32>
    %13 = math.tanh %12 : vector<8x64xf32>
    %14 = arith.truncf %13 : vector<8x64xf32> to vector<8x64xbf16>
    %c0_10 = arith.constant 0 : index
    %c0_11 = arith.constant 0 : index
    %15 = vector.load %arg6[%c0_10, %c0_11] : memref<64x4xbf16, #tpu.memory_space<vmem>>, vector<64x4xbf16>
    %cst_12 = arith.constant dense<0.000000e+00> : vector<8x4xf32>
    %16 = tpu.matmul %14, %15, %cst_12 {dimension_numbers = #tpu.dot_dimension_numbers<[1], [0], [0], [1], [0, 0, 1, 1], [], []>} : vector<8x64xbf16>, vector<64x4xbf16>, vector<8x4xf32> -> vector<8x4xf32>
    %c0_13 = arith.constant 0 : index
    %c0_14 = arith.constant 0 : index
    %17 = vector.load %arg7[%c0_13, %c0_14] : memref<1x4xf32, #tpu.memory_space<vmem>>, vector<1x4xf32>
    %18 = vector.broadcast %17 : vector<1x4xf32> to vector<8x4xf32>
    %19 = arith.addf %16, %18 : vector<8x4xf32>
    %20 = math.tanh %19 : vector<8x4xf32>
    %c0_15 = arith.constant 0 : index
    %c0_16 = arith.constant 0 : index
    %21 = vector.load %arg8[%c0_15, %c0_16] : memref<8x4xf32, #tpu.memory_space<vmem>>, vector<8x4xf32>
    tpu.vector_store %arg8[%c0_15, %c0_16], %20 {strides = array<i32>} : memref<8x4xf32, #tpu.memory_space<vmem>>, vector<8x4xf32>,
    return
  }
  func.func @transform_0(%arg0: i32) -> (i32, i32) {
    %c0_i32 = arith.constant 0 : i32
    %c0_i32_0 = arith.constant 0 : i32
    return %arg0, %c0_i32 : i32, i32
  }
  func.func @transform_1(%arg0: i32) -> (i32, i32) {
    %c0_i32 = arith.constant 0 : i32
    %c0_i32_0 = arith.constant 0 : i32
    %c0_i32_1 = arith.constant 0 : i32
    return %c0_i32, %c0_i32_0 : i32, i32
  }
  func.func @transform_2(%arg0: i32) -> (i32, i32) {
    %c0_i32 = arith.constant 0 : i32
    %c0_i32_0 = arith.constant 0 : i32
    %c0_i32_1 = arith.constant 0 : i32
    return %c0_i32, %c0_i32_0 : i32, i32
  }
  func.func @transform_3(%arg0: i32) -> (i32, i32) {
    %c0_i32 = arith.constant 0 : i32
    %c0_i32_0 = arith.constant 0 : i32
    %c0_i32_1 = arith.constant 0 : i32
    return %c0_i32, %c0_i32_0 : i32, i32
  }
  func.func @transform_4(%arg0: i32) -> (i32, i32) {
    %c0_i32 = arith.constant 0 : i32
    %c0_i32_0 = arith.constant 0 : i32
    %c0_i32_1 = arith.constant 0 : i32
    return %c0_i32, %c0_i32_0 : i32, i32
  }
  func.func @transform_5(%arg0: i32) -> (i32, i32) {
    %c0_i32 = arith.constant 0 : i32
    %c0_i32_0 = arith.constant 0 : i32
    %c0_i32_1 = arith.constant 0 : i32
    return %c0_i32, %c0_i32_0 : i32, i32
  }
  func.func @transform_6(%arg0: i32) -> (i32, i32) {
    %c0_i32 = arith.constant 0 : i32
    %c0_i32_0 = arith.constant 0 : i32
    %c0_i32_1 = arith.constant 0 : i32
    return %c0_i32, %c0_i32_0 : i32, i32
  }
  func.func @transform_7(%arg0: i32) -> (i32, i32) {
    %c0_i32 = arith.constant 0 : i32
    %c0_i32_0 = arith.constant 0 : i32
    return %arg0, %c0_i32 : i32, i32
  }
}

</mosaic_0001>

<bundles_post_ra>
// kernel: tpu_custom_call.1
= control target key start
LH: loop header
LB: loop body
LE: loop exit
PB: predicated region body
PF: predicated region fallthrough
CT: control target
= control target key end

     0   :  { %12 = vsyncpa [#allocation3], 0  ;;  %s377_s24 = smov [#allocation2]   ;;  %s466_s0 = inlined_call_operand.vmem [shape: bf16[8,16], index: 0, kind: input, shape index: {}]   ;;  %s467_s1 = inlined_call_operand.hbm [shape: bf16[16,64], index: 1, kind: input, shape index: {}]   ;;  %s468_s2 = inlined_call_operand.vmem [shape: f32[1,64], index: 2, kind: input, shape index: {}]   ;;  %s469_s3 = inlined_call_operand.vmem [shape: bf16[64,64], index: 3, kind: input, shape index: {}]   ;;  %s470_s4 = inlined_call_operand.vmem [shape: f32[1,64], index: 4, kind: input, shape index: {}]   ;;  %s471_s5 = inlined_call_operand.vmem [shape: bf16[64,4], index: 5, kind: input, shape index: {}]   ;;  %s472_s6 = inlined_call_operand.vmem [shape: f32[1,4], index: 6, kind: input, shape index: {}]   ;;  %s473_s7 = inlined_call_operand.vmem [shape: f32[8,4], index: 7, kind: output, shape index: {}]  }
   0x1   :  { %s20_s25 = sshll.u32 %s377_s24, 4  ;;  %s21_s25 = int_to_ptr.vmem [resolvable:$true] %s20_s25 }
   0x2   :  { %s363_s26 = scalar_lea.vmem %s21_s25, 128  ;;  %p368_p1 = scmp.lt.s32.totalorder %s21_s25, %s21_s25 }
   0x3   :  { %p364_p0 = scmp.ne.s32.totalorder %s21_s25, %s363_s26  ;;  %p369_p2 = scmp.lt.s32.totalorder %s363_s26, %s363_s26 }
   0x5   :  { %p370_p3 = por %p369_p2, %p368_p1 }
   0x7   :  { %p371_p4 = pnand %p370_p3, %p364_p0 }
   0x9   :  { %374 = shalt.err (!%p371_p4)
}
   0xa   :  { %s378_s27 = smov 64   ;;  %s379_s28 = smov 4  }
   0xb   :  { %26 = dma.hbm_to_vmem [thread:$0]  %s467_s1, 128, %s21_s25, [#allocation3], %s378_s27, %s378_s27, %s379_s28  }
   0xc   :  { %375 = dma.done.wait [#allocation3], 128  }
   0xd   :  { %376 = vsyncadd [#allocation3], 4294967168  ;;  %v380_v0 = vmov 0.0   ;;  %vm381_vm0 = vmmov 0   ;;  %v340_v1 = vld [vmem:[#allocation2] sm:$0xff]   ;;  %vm57_vm1 = vcmask 130048  }
   0xe   :  { %305 = vmatprep.subr.bf16.mxu0 %v380_v0  ;;  %307 = vmatprep.mubr.msk.bf16.mxu0 %vm381_vm0, %v380_v0  ;;  %v41_v2 = vld [vmem:[%s466_s0] sm:$0xf]  ;;  %v341_v3 = vld [vmem:[%s469_s3 + $0x18] sm:$0xff]   ;;  %v342_v4 = vld [vmem:[%s469_s3 + $0x10] sm:$0xff]   ;;  %vm142_vm2 = vcmask 523264   ;;  %vm271_vm3 = vcmask 31744  }
   0xf   :  { %311 = vmatprep.subr.bf16.mxu1 %v380_v0  ;;  %319 = vmatprep.mubr.msk.bf16.mxu1 %vm381_vm0, %v380_v0  ;;  %v343_v5 = vld [vmem:[%s469_s3 + $0x8] sm:$0xff]   ;;  %v344_v6 = vld [vmem:[%s469_s3] sm:$0xff]   ;;  %v345_v15 = vld [vmem:[%s471_s5 + $0x18] sm:$0xff]  }
  0x10   :  { %306 = vmatpush3.bf16.msra.mxu0 %v340_v1  ;;  %312 = vmatpush3.bf16.msra.mxu1 %v341_v3  ;;  %v278_v7 = vld [vmem:[%s468_s2] ss:$0 sm:$0xff]  ;;  %v346_v16 = vld [vmem:[%s471_s5 + $0x10] sm:$0xff]   ;;  %v347_v17 = vld [vmem:[%s471_s5 + $0x8] sm:$0xff]  }
  0x11   :  { %323 = vmatprep.subr.bf16.mxu0 %v380_v0  ;;  %313 = vmatprep.subr.bf16.mxu1 %v380_v0  ;;  %v348_v18 = vld [vmem:[%s471_s5] sm:$0xff]  }
  0x12   :  { %v281_v19 = vld [vmem:[%s470_s4] ss:$0 sm:$0xff] }
  0x13   :  { %308 = vmatmul.mubr.msk.bf16.vlgmr.msra.gmra.mxu0 %vm57_vm1, %v41_v2  ;;  %v287_v27 = vld [vmem:[%s472_s6] ss:$0 sm:$0xff] }
  0x14   :  { %331 = vmatprep.mubr.msk.bf16.mxu0 %vm381_vm0, %v380_v0  ;;  %314 = vmatpush3.bf16.msra.mxu1 %v342_v4 }
  0x15   :  { %315 = vmatprep.subr.bf16.mxu1 %v380_v0  ;;  %324 = vmatpush3.bf16.msra.mxu0 %v345_v15 }
  0x16   :  { %325 = vmatprep.subr.bf16.mxu0 %v380_v0 }
  0x18   :  { %316 = vmatpush3.bf16.msra.mxu1 %v343_v5 }
  0x19   :  { %317 = vmatprep.subr.bf16.mxu1 %v380_v0  ;;  %326 = vmatpush3.bf16.msra.mxu0 %v346_v16 }
  0x1a   :  { %327 = vmatprep.subr.bf16.mxu0 %v380_v0 }
  0x1c   :  { %318 = vmatpush3.bf16.msra.mxu1 %v344_v6 }
  0x1d   :  { %328 = vmatpush3.bf16.msra.mxu0 %v347_v17 }
  0x1e   :  { %329 = vmatprep.subr.bf16.mxu0 %v380_v0 }
  0x21   :  { %330 = vmatpush3.bf16.msra.mxu0 %v348_v18 }
  0xd3   :  { %v95_v8 = vpop.f32.mrf.mxu0 }
  0xd4   :  { %v96_v9 = vadd.f32 %v278_v7, %v95_v8 }
  0xd5   :  { %v309_v10 = vpop.f32.mrf.mxu0 }
  0xd6   :  { %349 = vtanh.f32 %v96_v9 }
  0xd7   :  { %v98_v11 = vpop.f32.mrf.mxu0 }
  0xd9   :  { %v310_v12 = vpop.f32.mrf.mxu0 }
  0xe3   :  { %v350_v13 = vpop.eup %349 }
  0xe4   :  { %v102_v14 = vpack.c.bf16 %v350_v13, %v350_v13 }
  0xe6   :  { %320 = vmatmul.mubr.msk.bf16.vlgmr.msra.gmra.mxu1 %vm142_vm2, %v102_v14 }
 0x1a6   :  { %v180_v20 = vpop.f32.mrf.mxu1 }
 0x1a7   :  { %v181_v21 = vadd.f32 %v281_v19, %v180_v20 }
 0x1a8   :  { %v321_v22 = vpop.f32.mrf.mxu1 }
 0x1a9   :  { %351 = vtanh.f32 %v181_v21 }
 0x1aa   :  { %v183_v23 = vpop.f32.mrf.mxu1 }
 0x1ac   :  { %v322_v24 = vpop.f32.mrf.mxu1 }
 0x1b6   :  { %v352_v25 = vpop.eup %351 }
 0x1b7   :  { %v187_v26 = vpack.c.bf16 %v352_v25, %v352_v25 }
 0x1b9   :  { %332 = vmatmul.mubr.msk.bf16.vlgmr.msra.gmra.mxu0 %vm142_vm2, %v187_v26 }
 0x279   :  { %v264_v28 = vpop.f32.mrf.mxu0 }
 0x27a   :  { %v265_v29 = vadd.f32 %v287_v27, %v264_v28 }
 0x27b   :  { %v333_v30 = vpop.f32.mrf.mxu0 }
 0x27c   :  { %353 = vtanh.f32 %v265_v29 }
 0x27d   :  { %v267_v31 = vpop.f32.mrf.mxu0 }
 0x27f   :  { %v334_v32 = vpop.f32.mrf.mxu0 }
 0x289   :  { %v354_v33 = vpop.eup %353 }
 0x28a   :  { %272 = vst.msk [vmem:[%s473_s7] sm:$0xff] %vm271_vm3, %v354_v33 }
 0x28b   :  { %277 = vsyncpa [#allocation3], 1 }

</bundles_post_ra>
